<compile_context>
chip_gen: v7x
topology: tpu7x:2x2x1
jax: 0.10.0
libtpu: 0.0.40
codegen_flags: <defaults>
</compile_context>

<pallas_src>
import functools

import jax
import jax.numpy as jnp
from jax import lax
from jax.experimental import pallas as pl
from jax.experimental.pallas import tpu as pltpu

EPS = 1e-5
_LANE = 128
_TARGET_TILE_BYTES = 2 << 20   # ~2 MiB per streamed buffer (~HBM roofline knee)
_TARGET_ROW_STEPS = 8          # aim for >= 8 row-grid steps (megacore balance)


def _round_up(x, m):
    return ((x + m - 1) // m) * m


def _cdiv(a, b):
    return -(-a // b)


def _sublane(dtype):
    return max(8, 32 // jnp.dtype(dtype).itemsize)


def _vmem_capacity_bytes():
    try:
        info = pltpu.get_tpu_info()
        cap = getattr(info, "vmem_capacity_bytes", None)
        if cap:
            return int(cap)
    except Exception:
        pass
    return 64 * 1024 * 1024  # conservative (v7x per-TC VMEM)


# --------------------------------------------------------------------------
# Kernels
# --------------------------------------------------------------------------
def _in_fused_kernel(x_ref, g_ref, b_ref, o_ref, *, hw_true):
    """Whole-row instance norm: one HBM read, one write, centered variance."""
    x = x_ref[...].astype(jnp.float32)
    inv_n = jnp.float32(1.0 / hw_true)
    mean = jnp.sum(x, axis=-1, keepdims=True) * inv_n
    xc = x - mean
    var = jnp.sum(xc * xc, axis=-1, keepdims=True) * inv_n
    a = g_ref[...] * lax.rsqrt(var + EPS)
    o_ref[...] = (xc * a + b_ref[...]).astype(o_ref.dtype)


def _in_stats_kernel(x_ref, g_ref, bt_ref, a_ref, b_ref, s_acc, ss_acc, *,
                     hw_true, hw_chunk):
    """Chunked pass 1: accumulate sum / sumsq over hw chunks, emit (a, b).

    The last hw chunk may be ragged; out-of-range lanes are masked before the
    reduction (boundary lanes are NOT guaranteed to be zero)."""
    k = pl.program_id(1)

    @pl.when(k == 0)
    def _():
        s_acc[...] = jnp.zeros_like(s_acc)
        ss_acc[...] = jnp.zeros_like(ss_acc)

    x = x_ref[...].astype(jnp.float32)
    col = k * hw_chunk + lax.broadcasted_iota(jnp.int32, x.shape, 1)
    x = jnp.where(col < hw_true, x, 0.0)
    s_acc[...] += jnp.sum(x, axis=-1, keepdims=True)
    ss_acc[...] += jnp.sum(x * x, axis=-1, keepdims=True)

    @pl.when(k == pl.num_programs(1) - 1)
    def _():
        inv_n = jnp.float32(1.0 / hw_true)
        mean = s_acc[...] * inv_n
        var = jnp.maximum(ss_acc[...] * inv_n - mean * mean, 0.0)
        a = g_ref[...] * lax.rsqrt(var + EPS)
        a_ref[...] = a
        b_ref[...] = bt_ref[...] - mean * a


def _in_apply_kernel(x_ref, a_ref, b_ref, o_ref):
    """Chunked pass 2: y = x * a + b (OOB tail garbage is dropped on write)."""
    x = x_ref[...].astype(jnp.float32)
    o_ref[...] = (x * a_ref[...] + b_ref[...]).astype(o_ref.dtype)


# --------------------------------------------------------------------------
# Wrapper
# --------------------------------------------------------------------------
def switching_normalization_fwd(x, gamma, beta, *, vmem_budget_bytes=None):
    """Forward of switching_normalization (mode==0 -> instance norm).

    x: (N, C, *spatial); gamma, beta: (C,).  Returns array of x's shape/dtype.
    """
    N, C = int(x.shape[0]), int(x.shape[1])
    HW = 1
    for d in x.shape[2:]:
        HW *= int(d)
    NC = N * C
    dtype = x.dtype
    itemsize = jnp.dtype(dtype).itemsize
    sub = _sublane(dtype)

    cap = _vmem_capacity_bytes()
    if vmem_budget_bytes is None:
        vmem_budget_bytes = int(0.5 * cap)

    HW_lanes = _round_up(HW, _LANE)          # physical lane width (accounting)
    x2 = x.reshape(NC, HW)                   # metadata-only reshape, no copy
    # Per-row affine params: row = n*C + c -> gamma[c], beta[c]  (tiny arrays).
    g_rows = jnp.tile(gamma.astype(jnp.float32), (N,)).reshape(NC, 1)
    b_rows = jnp.tile(beta.astype(jnp.float32), (N,)).reshape(NC, 1)

    # Per-row VMEM footprint of the fused kernel:
    #   2x in + 2x out double-buffered tiles (input dtype) + ~3 f32 temps.
    row_bytes = HW_lanes * (4 * itemsize + 3 * 4)

    if sub * row_bytes <= vmem_budget_bytes:
        # ---------------- fast path: whole rows, single HBM pass -----------
        rows_by_tile = max(sub,
                           (_TARGET_TILE_BYTES // (HW_lanes * itemsize))
                           // sub * sub)
        rows_by_vmem = max(sub, (vmem_budget_bytes // row_bytes) // sub * sub)
        rows_by_steps = _round_up(_cdiv(NC, _TARGET_ROW_STEPS), sub)
        block_rows = max(sub, min(rows_by_tile, rows_by_vmem, rows_by_steps))
        if block_rows >= NC:
            block_rows = NC          # whole-dim block is legal for any NC
        grid = (_cdiv(NC, block_rows),)

        tile_in = block_rows * HW_lanes * itemsize
        tile_f32 = block_rows * HW_lanes * 4
        vmem_limit = int(min(max(4 * tile_in + 3 * tile_f32 + (4 << 20),
                                 32 << 20),
                             0.9 * cap))

        out2 = pl.pallas_call(
            functools.partial(_in_fused_kernel, hw_true=HW),
            out_shape=jax.ShapeDtypeStruct((NC, HW), dtype),
            grid_spec=pltpu.PrefetchScalarGridSpec(
                num_scalar_prefetch=0,
                grid=grid,
                in_specs=[
                    pl.BlockSpec((block_rows, HW), lambda i: (i, 0)),
                    pl.BlockSpec((block_rows, 1), lambda i: (i, 0)),
                    pl.BlockSpec((block_rows, 1), lambda i: (i, 0)),
                ],
                out_specs=pl.BlockSpec((block_rows, HW), lambda i: (i, 0)),
            ),
            compiler_params=pltpu.CompilerParams(
                dimension_semantics=("parallel",),
                vmem_limit_bytes=vmem_limit,
            ),
        )(x2, g_rows, b_rows)

    else:
        # ------------- chunked path: tile the HW (reduction) axis ----------
        block_rows = max(sub,
                         min(128, _round_up(_cdiv(NC, _TARGET_ROW_STEPS), sub)))
        if block_rows >= NC:
            block_rows = NC
        tile_budget = max(_LANE * block_rows * itemsize,
                          min(_TARGET_TILE_BYTES, vmem_budget_bytes // 8))
        hw_chunk = max(_LANE,
                       (tile_budget // (block_rows * itemsize)) // _LANE * _LANE)
        hw_chunk = min(hw_chunk, max(_LANE, (HW // _LANE) * _LANE))
        grid = (_cdiv(NC, block_rows), _cdiv(HW, hw_chunk))

        tile_in = block_rows * hw_chunk * itemsize
        tile_f32 = block_rows * hw_chunk * 4
        vmem_limit = int(min(max(4 * tile_in + 2 * tile_f32 + (4 << 20),
                                 32 << 20),
                             0.9 * cap))

        # Pass 1: per-row scale/shift (a, b) via accumulated sum / sumsq.
        a_rows, b_shift = pl.pallas_call(
            functools.partial(_in_stats_kernel, hw_true=HW, hw_chunk=hw_chunk),
            out_shape=(jax.ShapeDtypeStruct((NC, 1), jnp.float32),
                       jax.ShapeDtypeStruct((NC, 1), jnp.float32)),
            grid_spec=pltpu.PrefetchScalarGridSpec(
                num_scalar_prefetch=0,
                grid=grid,
                in_specs=[
                    pl.BlockSpec((block_rows, hw_chunk), lambda i, k: (i, k)),
                    pl.BlockSpec((block_rows, 1), lambda i, k: (i, 0)),
                    pl.BlockSpec((block_rows, 1), lambda i, k: (i, 0)),
                ],
                out_specs=[
                    pl.BlockSpec((block_rows, 1), lambda i, k: (i, 0)),
                    pl.BlockSpec((block_rows, 1), lambda i, k: (i, 0)),
                ],
                scratch_shapes=[pltpu.VMEM((block_rows, 1), jnp.float32),
                                pltpu.VMEM((block_rows, 1), jnp.float32)],
            ),
            compiler_params=pltpu.CompilerParams(
                dimension_semantics=("parallel", "arbitrary"),
                vmem_limit_bytes=vmem_limit,
            ),
        )(x2, g_rows, b_rows)

        # Pass 2: y = x * a + b, streamed over (row block, hw chunk).
        out2 = pl.pallas_call(
            _in_apply_kernel,
            out_shape=jax.ShapeDtypeStruct((NC, HW), dtype),
            grid_spec=pltpu.PrefetchScalarGridSpec(
                num_scalar_prefetch=0,
                grid=grid,
                in_specs=[
                    pl.BlockSpec((block_rows, hw_chunk), lambda i, k: (i, k)),
                    pl.BlockSpec((block_rows, 1), lambda i, k: (i, 0)),
                    pl.BlockSpec((block_rows, 1), lambda i, k: (i, 0)),
                ],
                out_specs=pl.BlockSpec((block_rows, hw_chunk),
                                       lambda i, k: (i, k)),
            ),
            compiler_params=pltpu.CompilerParams(
                dimension_semantics=("parallel", "parallel"),
                vmem_limit_bytes=vmem_limit,
            ),
        )(x2, a_rows, b_shift)

    return out2.reshape(x.shape)


# --------------------------------------------------------------------------
# Reference & test
# --------------------------------------------------------------------------
def reference_instance_norm(x, gamma, beta):
    xf = x.astype(jnp.float32)
    red_axes = tuple(range(2, x.ndim))
    mean = jnp.mean(xf, axis=red_axes, keepdims=True)
    var = jnp.mean((xf - mean) ** 2, axis=red_axes, keepdims=True)
    y = (xf - mean) / jnp.sqrt(var + EPS)
    bshape = (1, -1) + (1,) * (x.ndim - 2)
    y = y * gamma.reshape(bshape) + beta.reshape(bshape)
    return y.astype(x.dtype)


if __name__ == "__main__":
    key = jax.random.PRNGKey(0)
    kx, kg, kb, kx2 = jax.random.split(key, 4)

    # Small NCHW input consistent with the module (num_features = C).
    N, C, H, W = 2, 4, 16, 16
    x = jax.random.normal(kx, (N, C, H, W), dtype=jnp.float32)
    gamma = 1.0 + 0.1 * jax.random.normal(kg, (C,), dtype=jnp.float32)
    beta = 0.1 * jax.random.normal(kb, (C,), dtype=jnp.float32)

    # 1) Auto-sized (fast, whole-row, single HBM pass) path.
    out = switching_normalization_fwd(x, gamma, beta)
    out = jax.block_until_ready(out)
    ref = reference_instance_norm(x, gamma, beta)
    assert jnp.allclose(out, ref, atol=1e-4, rtol=1e-4), "fast-path mismatch"

    # 2) Force the chunked (HW-tiled, two-pass) path with a tiny VMEM budget.
    out_c = switching_normalization_fwd(x, gamma, beta,
                                        vmem_budget_bytes=16 * 1024)
    out_c = jax.block_until_ready(out_c)
    assert jnp.allclose(out_c, ref, atol=1e-4, rtol=1e-4), \
        "chunked-path mismatch"

    # 3) Unaligned shape (ragged lane tail + non-multiple-of-8 rows,
    #    handled in-kernel without any wrapper pad/slice).
    xu = jax.random.normal(kx2, (2, 3, 10, 15), dtype=jnp.float32)
    gu = 1.0 + 0.1 * jax.random.normal(kg, (3,), dtype=jnp.float32)
    bu = 0.1 * jax.random.normal(kb, (3,), dtype=jnp.float32)
    out_u = jax.block_until_ready(switching_normalization_fwd(xu, gu, bu))
    ref_u = reference_instance_norm(xu, gu, bu)
    assert jnp.allclose(out_u, ref_u, atol=1e-4, rtol=1e-4), \
        "padded-path mismatch"

    print("KERNEL_OK")
</pallas_src>

<mosaic_0001>
module attributes {stable_mosaic.version = 11 : i64} {
  func.func @_in_fused_kernel(%arg0: i32, %arg1: memref<8x256xf32, #tpu.memory_space<vmem>>, %arg2: memref<8x1xf32, #tpu.memory_space<vmem>>, %arg3: memref<8x1xf32, #tpu.memory_space<vmem>>, %arg4: memref<8x256xf32, #tpu.memory_space<vmem>>) attributes {dimension_semantics = [#tpu.dimension_semantics<parallel>], iteration_bounds = array<i64: 1>, scalar_prefetch = 0 : i64, scratch_operands = 0 : i64, tpu.core_type = #tpu.core_type<tc>, window_params = [{transform_indices = @transform_0, window_bounds = array<i64: 8, 256>}, {transform_indices = @transform_1, window_bounds = array<i64: 8, 1>}, {transform_indices = @transform_2, window_bounds = array<i64: 8, 1>}, {transform_indices = @transform_3, window_bounds = array<i64: 8, 256>}]} {
    %c0 = arith.constant 0 : index
    %c0_0 = arith.constant 0 : index
    %0 = vector.load %arg1[%c0, %c0_0] : memref<8x256xf32, #tpu.memory_space<vmem>>, vector<8x256xf32>
    %cst = arith.constant dense<0.000000e+00> : vector<8xf32>
    %1 = vector.multi_reduction <add>, %0, %cst [1] : vector<8x256xf32> to vector<8xf32>
    %2 = vector.shape_cast %1 : vector<8xf32> to vector<8x1xf32>
    %cst_1 = arith.constant 3.906250e-03 : f32
    %3 = vector.broadcast %cst_1 : f32 to vector<8x1xf32>
    %4 = arith.mulf %2, %3 : vector<8x1xf32>
    %5 = vector.broadcast %4 : vector<8x1xf32> to vector<8x256xf32>
    %6 = arith.subf %0, %5 : vector<8x256xf32>
    %7 = arith.mulf %6, %6 : vector<8x256xf32>
    %cst_2 = arith.constant dense<0.000000e+00> : vector<8xf32>
    %8 = vector.multi_reduction <add>, %7, %cst_2 [1] : vector<8x256xf32> to vector<8xf32>
    %9 = vector.shape_cast %8 : vector<8xf32> to vector<8x1xf32>
    %cst_3 = arith.constant 3.906250e-03 : f32
    %10 = vector.broadcast %cst_3 : f32 to vector<8x1xf32>
    %11 = arith.mulf %9, %10 : vector<8x1xf32>
    %c0_4 = arith.constant 0 : index
    %c0_5 = arith.constant 0 : index
    %12 = vector.load %arg2[%c0_4, %c0_5] : memref<8x1xf32, #tpu.memory_space<vmem>>, vector<8x1xf32>
    %cst_6 = arith.constant 9.99999974E-6 : f32
    %13 = vector.broadcast %cst_6 : f32 to vector<8x1xf32>
    %14 = arith.addf %11, %13 : vector<8x1xf32>
    %15 = math.rsqrt %14 : vector<8x1xf32>
    %16 = arith.mulf %12, %15 : vector<8x1xf32>
    %17 = vector.broadcast %16 : vector<8x1xf32> to vector<8x256xf32>
    %18 = arith.mulf %6, %17 : vector<8x256xf32>
    %c0_7 = arith.constant 0 : index
    %c0_8 = arith.constant 0 : index
    %19 = vector.load %arg3[%c0_7, %c0_8] : memref<8x1xf32, #tpu.memory_space<vmem>>, vector<8x1xf32>
    %20 = vector.broadcast %19 : vector<8x1xf32> to vector<8x256xf32>
    %21 = arith.addf %18, %20 : vector<8x256xf32>
    %c0_9 = arith.constant 0 : index
    %c0_10 = arith.constant 0 : index
    %22 = vector.load %arg4[%c0_9, %c0_10] : memref<8x256xf32, #tpu.memory_space<vmem>>, vector<8x256xf32>
    tpu.vector_store %arg4[%c0_9, %c0_10], %21 {strides = array<i32>} : memref<8x256xf32, #tpu.memory_space<vmem>>, vector<8x256xf32>,
    return
  }
  func.func @transform_0(%arg0: i32) -> (i32, i32) {
    %c0_i32 = arith.constant 0 : i32
    %c0_i32_0 = arith.constant 0 : i32
    return %arg0, %c0_i32 : i32, i32
  }
  func.func @transform_1(%arg0: i32) -> (i32, i32) {
    %c0_i32 = arith.constant 0 : i32
    %c0_i32_0 = arith.constant 0 : i32
    return %arg0, %c0_i32 : i32, i32
  }
  func.func @transform_2(%arg0: i32) -> (i32, i32) {
    %c0_i32 = arith.constant 0 : i32
    %c0_i32_0 = arith.constant 0 : i32
    return %arg0, %c0_i32 : i32, i32
  }
  func.func @transform_3(%arg0: i32) -> (i32, i32) {
    %c0_i32 = arith.constant 0 : i32
    %c0_i32_0 = arith.constant 0 : i32
    return %arg0, %c0_i32 : i32, i32
  }
}

</mosaic_0001>

<bundles_post_ra>
// kernel: tpu_custom_call.1
= control target key start
LH: loop header
LB: loop body
LE: loop exit
PB: predicated region body
PF: predicated region fallthrough
CT: control target
= control target key end

     0   :  { %s140_s0 = inlined_call_operand.vmem [shape: f32[8,256], index: 0, kind: input, shape index: {}]   ;;  %s141_s1 = inlined_call_operand.vmem [shape: f32[8,1], index: 1, kind: input, shape index: {}]   ;;  %s142_s2 = inlined_call_operand.vmem [shape: f32[8,1], index: 2, kind: input, shape index: {}]   ;;  %s143_s3 = inlined_call_operand.hbm [shape: f32[8,256], index: 3, kind: output, shape index: {}]  }
   0x1   :  { %v15_v0 = vld [vmem:[%s140_s0] sm:$0xff]  ;;  %v16_v1 = vld [vmem:[%s140_s0 + $0x8] sm:$0xff] }
   0x2   :  { %8 = vsyncpa [#allocation3], 0  ;;  %v17_v2 = vadd.f32 %v16_v1, %v15_v0  ;;  %v94_v10 = vmov 0   ;;  %v29_v14 = vld [vmem:[%s141_s1] sm:$0xff]  ;;  %s95_s19 = smov [#allocation2]  }
   0x3   :  { %66 = vset.pattern.permute.xlu1 %v94_v10  ;;  %67 = vset.pattern.permute.xlu0 %v94_v10  ;;  %v40_v17 = vld [vmem:[%s142_s2] sm:$0xff]  ;;  %s56_s20 = sshll.u32 %s95_s19, 4  ;;  %s57_s20 = int_to_ptr.vmem [resolvable:$true] %s56_s20 }
   0x4   :  { %18 = vadd.xlane.f32.xlu0 %v17_v2  ;;  %s70_s1 = scalar_lea.vmem %s57_s20, 256  ;;  %p75_p1 = scmp.lt.s32.totalorder %s57_s20, %s57_s20 }
   0x5   :  { %p71_p0 = scmp.ne.s32.totalorder %s57_s20, %s70_s1  ;;  %p76_p2 = scmp.lt.s32.totalorder %s70_s1, %s70_s1 }
   0x7   :  { %p77_p3 = por %p76_p2, %p75_p1 }
   0x9   :  { %p78_p4 = pnand %p77_p3, %p71_p0 }
  0x91   :  { %v19_v3 = vpop.xlane.xlu0 %18 }
  0x92   :  { %v20_v4 = vmul.f32 0.00390625, %v19_v3 }
  0x94   :  { %v21_v5 = vsub.f32 %v15_v0, %v20_v4  ;;  %v22_v6 = vsub.f32 %v16_v1, %v20_v4 }
  0x96   :  { %v23_v7 = vmul.f32 %v21_v5, %v21_v5  ;;  %v24_v8 = vmul.f32 %v22_v6, %v22_v6 }
  0x98   :  { %v25_v9 = vadd.f32 %v24_v8, %v23_v7 }
  0x9a   :  { %26 = vadd.xlane.f32.xlu0 %v25_v9 }
 0x127   :  { %v27_v11 = vpop.xlane.xlu0 %26 }
 0x128   :  { %v28_v12 = vmul.f32 0.00390625, %v27_v11 }
 0x12a   :  { %v30_v13 = vadd.f32 1e-05, %v28_v12 }
 0x12c   :  { %68 = vrsqrt.f32 %v30_v13 }
 0x136   :  { %v69_v15 = vpop.eup %68 }
 0x137   :  { %v32_v16 = vmul.f32 %v69_v15, %v29_v14 }
 0x139   :  { %35 = vperm.xlu1 %66, %v32_v16  }
 0x13d   :  { %43 = vperm.xlu1 %66, %v40_v17  }
 0x1b8   :  { %v36_v18 = vpop.permute.xlu1 %35 }
 0x1b9   :  { %v38_v19 = vmul.f32 %v36_v18, %v21_v5  ;;  %v39_v20 = vmul.f32 %v36_v18, %v22_v6 }
 0x1bc   :  { %v44_v21 = vpop.permute.xlu1 %43 }
 0x1bd   :  { %v46_v22 = vadd.f32 %v44_v21, %v38_v19  ;;  %v47_v23 = vadd.f32 %v44_v21, %v39_v20 }
 0x1bf   :  { %48 = vst [vmem:[#allocation2] sm:$0xff] %v46_v22  ;;  %49 = vst [vmem:[#allocation2 + $0x8] sm:$0xff] %v47_v23 }
 0x1c0   :  { %81 = shalt.err (!%p78_p4)
}
 0x1c1   :  { %s82_s22 = scalar_lea.hbm %s143_s3, 256 }
 0x1c2   :  { %p83_p5 = scmp.ne.s32.totalorder %s143_s3, %s82_s22  ;;  %p86_p6 = scmp.lt.u32.totalorder %s82_s22, %s143_s3 }
 0x1c4   :  { %p88_p7 = pnand %p86_p6, %p83_p5 }
 0x1c6   :  { %91 = shalt.err (!%p88_p7)
}
 0x1c7   :  { %59 = dma.vmem_to_hbm [thread:$0]  %s57_s20, 256, %s143_s3, [#allocation3]  }
 0x1c8   :  { %92 = dma.done.wait [#allocation3], 256  }
 0x1c9   :  { %93 = vsyncadd [#allocation3], 4294967040 }
 0x1ca   :  { %63 = vsyncpa [#allocation3], 1 }

</bundles_post_ra>
